<compile_context>
chip_gen: v7x
topology: tpu7x:2x2x1
jax: 0.10.0
libtpu: 0.0.40
codegen_flags: <defaults>
</compile_context>

<pallas_src>
import functools

import jax
import jax.numpy as jnp
from jax.experimental import pallas as pl
from jax.experimental.pallas import tpu as pltpu


def _mlp_kernel(x_ref, w1_ref, b1_ref, w2_ref, b2_ref, w3_ref, b3_ref, o_ref,
                *, mm_dtype):
    """One batch tile of fc3(tanh(fc2(tanh(fc1(x))))).

    Shapes:
      x_ref : (bb, inp_dim)       batch on sublanes in HBM/VMEM
      w1_ref: (nhidden, inp_dim)  b1_ref: (nhidden, 1)
      w2_ref: (nhidden, nhidden)  b2_ref: (nhidden, 1)
      w3_ref: (nhidden, out_dim)  b3_ref: (out_dim, 1)
      o_ref : (out_dim, bb)       batch on lanes (lane-dense output)
    """
    x = x_ref[...]                                     # (bb, inp_dim)

    # fc1: contract inp_dim of both operands -> (nhidden, bb); the transpose
    # of the x tile is absorbed by the MXU contraction, so the batch lands on
    # the lane axis and stays there for the rest of the kernel.
    h = jax.lax.dot_general(
        w1_ref[...].astype(mm_dtype), x.astype(mm_dtype),
        (((1,), (1,)), ((), ())),
        preferred_element_type=jnp.float32)
    h = jnp.tanh(h + b1_ref[...])                      # f32

    # fc2: (nhidden, nhidden) @ (nhidden, bb)
    h = jnp.dot(w2_ref[...].astype(mm_dtype), h.astype(mm_dtype),
                preferred_element_type=jnp.float32)
    h = jnp.tanh(h + b2_ref[...])                      # f32

    # fc3: out_dim is tiny (1) -> VPU multiply + sublane reduction instead of
    # an M=1 MXU matmul; result is lane-dense (out_dim, bb).
    if o_ref.shape[0] == 1:
        out = jnp.sum(h * w3_ref[...], axis=0, keepdims=True) + b3_ref[...]
    else:
        out = jax.lax.dot_general(
            w3_ref[...], h, (((0,), (0,)), ((), ())),
            preferred_element_type=jnp.float32) + b3_ref[...]

    o_ref[...] = out.astype(o_ref.dtype)


_MAX_TILE = 1024   # (32, 1024) f32 activation = 32 vregs; bigger risks spills
_SPLIT_MIN = 512   # below this a single tile beats splitting across 2 TCs


def _pick_batch_tile(B):
    """Lane (batch) tile: big tiles, even grid length for v7x's two TCs."""
    if B <= _SPLIT_MIN:
        return B                                   # single full-extent tile
    ntiles = 2 * pl.cdiv(B, 2 * _MAX_TILE)         # even grid length
    return min(_MAX_TILE, ((pl.cdiv(B, ntiles) + 127) // 128) * 128)


@functools.partial(jax.jit, static_argnames=("use_bf16",))
def latent_ode_func(t, x, params, *, use_bf16=False):
    """forward(t, x) of LatentODEfunc. t is unused (only the solver reads it).

    x: (B, inp_dim). params in PyTorch-native layout: W (out, in), b (out,).
    Returns (B, out_dim). use_bf16 casts the matmul operands to bf16 (useful
    on v6e/v7x; keep False on v5e or when ODE tolerance is tight).
    """
    del t
    w1, b1, w2, b2, w3, b3 = params
    B, inp_dim = x.shape
    nhidden = w1.shape[0]
    out_dim = w3.shape[0]

    bb = _pick_batch_tile(B)
    grid = (pl.cdiv(B, bb),)

    # Bitcast-level layout fixes on the tiny parameter tensors.
    b1c = b1.reshape(nhidden, 1)
    b2c = b2.reshape(nhidden, 1)
    b3c = b3.reshape(out_dim, 1)
    w3c = w3.T                                     # (nhidden, out_dim)

    kernel = functools.partial(
        _mlp_kernel, mm_dtype=jnp.bfloat16 if use_bf16 else jnp.float32)

    out_fb = pl.pallas_call(
        kernel,
        out_shape=jax.ShapeDtypeStruct((out_dim, B), x.dtype),
        grid_spec=pltpu.PrefetchScalarGridSpec(
            num_scalar_prefetch=0,
            grid=grid,
            in_specs=[
                pl.BlockSpec((bb, inp_dim),      lambda i: (i, 0)),  # x tile
                pl.BlockSpec((nhidden, inp_dim), lambda i: (0, 0)),  # W1
                pl.BlockSpec((nhidden, 1),       lambda i: (0, 0)),  # b1
                pl.BlockSpec((nhidden, nhidden), lambda i: (0, 0)),  # W2
                pl.BlockSpec((nhidden, 1),       lambda i: (0, 0)),  # b2
                pl.BlockSpec((nhidden, out_dim), lambda i: (0, 0)),  # W3^T
                pl.BlockSpec((out_dim, 1),       lambda i: (0, 0)),  # b3
            ],
            out_specs=pl.BlockSpec((out_dim, bb), lambda i: (0, i)),
        ),
        compiler_params=pltpu.CompilerParams(
            dimension_semantics=("parallel",)),
    )(x, w1, b1c, w2, b2c, w3c, b3c)

    # (out_dim, B) -> (B, out_dim); for out_dim == 1 this is a bitcast, not an
    # extra HBM pass.
    return out_fb.T


def init_params(key, inp_dim, nhidden, out_dim, dtype=jnp.float32):
    """PyTorch-style init (uniform +-1/sqrt(fan_in)), PyTorch-native layout."""
    ks = jax.random.split(key, 6)

    def lin(kw, kb, fan_in, fan_out):
        bound = 1.0 / (fan_in ** 0.5)
        w = jax.random.uniform(kw, (fan_out, fan_in), dtype, -bound, bound)
        b = jax.random.uniform(kb, (fan_out,), dtype, -bound, bound)
        return w, b

    w1, b1 = lin(ks[0], ks[1], inp_dim, nhidden)
    w2, b2 = lin(ks[2], ks[3], nhidden, nhidden)
    w3, b3 = lin(ks[4], ks[5], nhidden, out_dim)
    return (w1, b1, w2, b2, w3, b3)


def latent_ode_func_ref(t, x, params):
    del t
    w1, b1, w2, b2, w3, b3 = params
    h = jnp.tanh(x @ w1.T + b1)
    h = jnp.tanh(h @ w2.T + b2)
    return h @ w3.T + b3


if __name__ == "__main__":
    key = jax.random.PRNGKey(0)
    k_x, k_p = jax.random.split(key)

    inp_dim, nhidden, out_dim = 4, 32, 1
    params = init_params(k_p, inp_dim, nhidden, out_dim)
    t = jnp.float32(0.0)  # unused, matches the (t, x) forward signature

    # Small batch: single full-extent tile, grid=(1,).
    x_small = jax.random.normal(k_x, (8, inp_dim), jnp.float32)
    out_small = jax.block_until_ready(latent_ode_func(t, x_small, params))
    ref_small = latent_ode_func_ref(t, x_small, params)
    assert out_small.shape == (8, out_dim)
    assert jnp.allclose(out_small, ref_small, atol=1e-5, rtol=1e-5), "mismatch (B=8)"

    # Tile-unaligned batch: bb=512, grid=(2,) "parallel", partial (masked) last
    # tile — exercises the multi-tile path used on v7x's two TensorCores.
    x_big = jax.random.normal(jax.random.PRNGKey(1), (1000, inp_dim), jnp.float32)
    out_big = jax.block_until_ready(latent_ode_func(t, x_big, params))
    ref_big = latent_ode_func_ref(t, x_big, params)
    assert out_big.shape == (1000, out_dim)
    assert jnp.allclose(out_big, ref_big, atol=1e-5, rtol=1e-5), "mismatch (B=1000)"

    # Optional bf16-matmul path (intended for v6e/v7x); looser tolerance.
    out_bf16 = jax.block_until_ready(latent_ode_func(t, x_big, params, use_bf16=True))
    assert out_bf16.shape == (1000, out_dim)
    assert jnp.allclose(out_bf16, ref_big, atol=5e-2, rtol=5e-2), "mismatch (bf16)"

    print("KERNEL_OK")
</pallas_src>

<mosaic_0001>
module attributes {stable_mosaic.version = 11 : i64} {
  func.func @_mlp_kernel(%arg0: i32, %arg1: memref<8x4xf32, #tpu.memory_space<vmem>>, %arg2: memref<32x4xf32, #tpu.memory_space<vmem>>, %arg3: memref<32x1xf32, #tpu.memory_space<vmem>>, %arg4: memref<32x32xf32, #tpu.memory_space<vmem>>, %arg5: memref<32x1xf32, #tpu.memory_space<vmem>>, %arg6: memref<32x1xf32, #tpu.memory_space<vmem>>, %arg7: memref<1x1xf32, #tpu.memory_space<vmem>>, %arg8: memref<1x8xf32, #tpu.memory_space<vmem>>) attributes {dimension_semantics = [#tpu.dimension_semantics<parallel>], iteration_bounds = array<i64: 1>, scalar_prefetch = 0 : i64, scratch_operands = 0 : i64, tpu.core_type = #tpu.core_type<tc>, window_params = [{transform_indices = @transform_0, window_bounds = array<i64: 8, 4>}, {pipeline_mode = #tpu.pipeline_mode<synchronous>, transform_indices = @transform_1, window_bounds = array<i64: 32, 4>}, {pipeline_mode = #tpu.pipeline_mode<synchronous>, transform_indices = @transform_2, window_bounds = array<i64: 32, 1>}, {pipeline_mode = #tpu.pipeline_mode<synchronous>, transform_indices = @transform_3, window_bounds = array<i64: 32, 32>}, {pipeline_mode = #tpu.pipeline_mode<synchronous>, transform_indices = @transform_4, window_bounds = array<i64: 32, 1>}, {pipeline_mode = #tpu.pipeline_mode<synchronous>, transform_indices = @transform_5, window_bounds = array<i64: 32, 1>}, {pipeline_mode = #tpu.pipeline_mode<synchronous>, transform_indices = @transform_6, window_bounds = array<i64: 1, 1>}, {transform_indices = @transform_7, window_bounds = array<i64: 1, 8>}]} {
    %c0 = arith.constant 0 : index
    %c0_0 = arith.constant 0 : index
    %0 = vector.load %arg1[%c0, %c0_0] : memref<8x4xf32, #tpu.memory_space<vmem>>, vector<8x4xf32>
    %c0_1 = arith.constant 0 : index
    %c0_2 = arith.constant 0 : index
    %1 = vector.load %arg2[%c0_1, %c0_2] : memref<32x4xf32, #tpu.memory_space<vmem>>, vector<32x4xf32>
    %cst = arith.constant dense<0.000000e+00> : vector<32x8xf32>
    %2 = tpu.matmul %1, %0, %cst {dimension_numbers = #tpu.dot_dimension_numbers<[1], [1], [0], [0], [0, 0, 1, 0], [], []>} : vector<32x4xf32>, vector<8x4xf32>, vector<32x8xf32> -> vector<32x8xf32>
    %c0_3 = arith.constant 0 : index
    %c0_4 = arith.constant 0 : index
    %3 = vector.load %arg3[%c0_3, %c0_4] : memref<32x1xf32, #tpu.memory_space<vmem>>, vector<32x1xf32>
    %4 = vector.broadcast %3 : vector<32x1xf32> to vector<32x8xf32>
    %5 = arith.addf %2, %4 : vector<32x8xf32>
    %6 = math.tanh %5 : vector<32x8xf32>
    %c0_5 = arith.constant 0 : index
    %c0_6 = arith.constant 0 : index
    %7 = vector.load %arg4[%c0_5, %c0_6] : memref<32x32xf32, #tpu.memory_space<vmem>>, vector<32x32xf32>
    %cst_7 = arith.constant dense<0.000000e+00> : vector<32x8xf32>
    %8 = tpu.matmul %7, %6, %cst_7 {dimension_numbers = #tpu.dot_dimension_numbers<[1], [0], [0], [1], [0, 0, 1, 1], [], []>} : vector<32x32xf32>, vector<32x8xf32>, vector<32x8xf32> -> vector<32x8xf32>
    %c0_8 = arith.constant 0 : index
    %c0_9 = arith.constant 0 : index
    %9 = vector.load %arg5[%c0_8, %c0_9] : memref<32x1xf32, #tpu.memory_space<vmem>>, vector<32x1xf32>
    %10 = vector.broadcast %9 : vector<32x1xf32> to vector<32x8xf32>
    %11 = arith.addf %8, %10 : vector<32x8xf32>
    %12 = math.tanh %11 : vector<32x8xf32>
    %c0_10 = arith.constant 0 : index
    %c0_11 = arith.constant 0 : index
    %13 = vector.load %arg6[%c0_10, %c0_11] : memref<32x1xf32, #tpu.memory_space<vmem>>, vector<32x1xf32>
    %14 = vector.broadcast %13 : vector<32x1xf32> to vector<32x8xf32>
    %15 = arith.mulf %12, %14 : vector<32x8xf32>
    %cst_12 = arith.constant dense<0.000000e+00> : vector<8xf32>
    %16 = vector.multi_reduction <add>, %15, %cst_12 [0] : vector<32x8xf32> to vector<8xf32>
    %17 = vector.shape_cast %16 : vector<8xf32> to vector<1x8xf32>
    %c0_13 = arith.constant 0 : index
    %c0_14 = arith.constant 0 : index
    %18 = vector.load %arg7[%c0_13, %c0_14] : memref<1x1xf32, #tpu.memory_space<vmem>>, vector<1x1xf32>
    %19 = vector.broadcast %18 : vector<1x1xf32> to vector<1x8xf32>
    %20 = arith.addf %17, %19 : vector<1x8xf32>
    %c0_15 = arith.constant 0 : index
    %c0_16 = arith.constant 0 : index
    %21 = vector.load %arg8[%c0_15, %c0_16] : memref<1x8xf32, #tpu.memory_space<vmem>>, vector<1x8xf32>
    tpu.vector_store %arg8[%c0_15, %c0_16], %20 {strides = array<i32>} : memref<1x8xf32, #tpu.memory_space<vmem>>, vector<1x8xf32>,
    return
  }
  func.func @transform_0(%arg0: i32) -> (i32, i32) {
    %c0_i32 = arith.constant 0 : i32
    %c0_i32_0 = arith.constant 0 : i32
    return %arg0, %c0_i32 : i32, i32
  }
  func.func @transform_1(%arg0: i32) -> (i32, i32) {
    %c0_i32 = arith.constant 0 : i32
    %c0_i32_0 = arith.constant 0 : i32
    %c0_i32_1 = arith.constant 0 : i32
    return %c0_i32, %c0_i32_0 : i32, i32
  }
  func.func @transform_2(%arg0: i32) -> (i32, i32) {
    %c0_i32 = arith.constant 0 : i32
    %c0_i32_0 = arith.constant 0 : i32
    %c0_i32_1 = arith.constant 0 : i32
    return %c0_i32, %c0_i32_0 : i32, i32
  }
  func.func @transform_3(%arg0: i32) -> (i32, i32) {
    %c0_i32 = arith.constant 0 : i32
    %c0_i32_0 = arith.constant 0 : i32
    %c0_i32_1 = arith.constant 0 : i32
    return %c0_i32, %c0_i32_0 : i32, i32
  }
  func.func @transform_4(%arg0: i32) -> (i32, i32) {
    %c0_i32 = arith.constant 0 : i32
    %c0_i32_0 = arith.constant 0 : i32
    %c0_i32_1 = arith.constant 0 : i32
    return %c0_i32, %c0_i32_0 : i32, i32
  }
  func.func @transform_5(%arg0: i32) -> (i32, i32) {
    %c0_i32 = arith.constant 0 : i32
    %c0_i32_0 = arith.constant 0 : i32
    %c0_i32_1 = arith.constant 0 : i32
    return %c0_i32, %c0_i32_0 : i32, i32
  }
  func.func @transform_6(%arg0: i32) -> (i32, i32) {
    %c0_i32 = arith.constant 0 : i32
    %c0_i32_0 = arith.constant 0 : i32
    %c0_i32_1 = arith.constant 0 : i32
    return %c0_i32, %c0_i32_0 : i32, i32
  }
  func.func @transform_7(%arg0: i32) -> (i32, i32) {
    %c0_i32 = arith.constant 0 : i32
    %c0_i32_0 = arith.constant 0 : i32
    return %c0_i32, %arg0 : i32, i32
  }
}

</mosaic_0001>

<bundles_post_ra>
// kernel: latent_ode_func.1
= control target key start
LH: loop header
LB: loop body
LE: loop exit
PB: predicated region body
PF: predicated region fallthrough
CT: control target
= control target key end

     0   :  { %s588_s0 = inlined_call_operand.vmem [shape: f32[8,4], index: 0, kind: input, shape index: {}]   ;;  %s589_s1 = inlined_call_operand.vmem [shape: f32[32,4], index: 1, kind: input, shape index: {}]   ;;  %s590_s2 = inlined_call_operand.vmem [shape: f32[32,1], index: 2, kind: input, shape index: {}]   ;;  %s591_s3 = inlined_call_operand.vmem [shape: f32[32,32], index: 3, kind: input, shape index: {}]   ;;  %s592_s4 = inlined_call_operand.vmem [shape: f32[32,1], index: 4, kind: input, shape index: {}]   ;;  %s593_s5 = inlined_call_operand.vmem [shape: f32[32,1], index: 5, kind: input, shape index: {}]   ;;  %s594_s6 = inlined_call_operand.<no memory space> [shape: f32[1,1], index: 6, kind: input, shape index: {}]   ;;  %s595_s7 = inlined_call_operand.hbm [shape: f32[1,8], index: 7, kind: output, shape index: {}]  }
   0x1   :  { %v12_v0 = vstv %s594_s6 }
   0x2   :  { %13 = vst [vmem:[#allocation2] sm:$0x1] %v12_v0 }
   0x3   :  { %v29_v1 = vld [vmem:[%s588_s0] sm:$0xff]  ;;  %vm58_vm0 = vcmask 31744   ;;  %v31_v4 = vld [vmem:[%s589_s1 + $0x8] sm:$0xff]  ;;  %v458_v5 = vmov 0   ;;  %v36_v6 = vld [vmem:[%s590_s2 + $0x10] sm:$0xff] }
   0x4   :  { %v30_v2 = vld [vmem:[%s589_s1] sm:$0xff]  ;;  %384 = vmatprep.subr.msk.mxu0 %vm58_vm0, %v29_v1  ;;  %416 = vset.pattern.permute.xlu0 %v458_v5  ;;  %v32_v7 = vld [vmem:[%s589_s1 + $0x10] sm:$0xff]  ;;  %v35_v8 = vld [vmem:[%s590_s2 + $0x8] sm:$0xff] }
   0x5   :  { %386 = vmatprep.mubr.msk.f32.mxu0 %vm58_vm0, %v30_v2  ;;  %v34_v3 = vld [vmem:[%s590_s2] sm:$0xff]  ;;  %385 = vmatpush3.xpose.msk.msra.mxu0 %vm58_vm0, %v29_v1  ;;  %v37_v9 = vld [vmem:[%s590_s2 + $0x18] sm:$0xff] }
   0x6   :  { %40 = vperm.xlu0 %416, %v34_v3   ;;  %417 = vset.pattern.permute.xlu1 %v458_v5  ;;  %v33_v10 = vld [vmem:[%s589_s1 + $0x18] sm:$0xff] }
   0x7   :  { %50 = vperm.xlu1 %417, %v36_v6  }
   0x8   :  { %387 = vmatmul.mubr.msk.f32.vlgmr.msra.gmra.mrb[0].mxu0 %vm58_vm0, %v31_v4 }
   0x9   :  { %389 = vmatprep.mubr.msk.f32.mxu0 %vm58_vm0, %v32_v7 }
   0xa   :  { %14 = vsyncpa [#allocation4], 0  ;;  %45 = vperm.xlu0 %416, %v35_v8   ;;  %v167_v11 = vld [vmem:[%s592_s4] sm:$0xff]  ;;  %v168_v12 = vld [vmem:[%s592_s4 + $0x8] sm:$0xff]  ;;  %vm191_vm1 = vcmask 261120   ;;  %vm321_vm2 = vcmask 64512   ;;  %v341_v8 = vlaneseq }
   0xb   :  { %55 = vperm.xlu1 %417, %v37_v9   ;;  %v169_v13 = vld [vmem:[%s592_s4 + $0x10] sm:$0xff]  ;;  %v170_v14 = vld [vmem:[%s592_s4 + $0x18] sm:$0xff]  ;;  %v293_v15 = vld [vmem:[%s593_s5] sm:$0xff]  ;;  %vm346_vm3 = vcmask 57344  }
   0xc   :  { %390 = vmatmul.mubr.msk.f32.gmra.mrb[2].mxu0 %vm58_vm0, %v33_v10  ;;  %v294_v16 = vld [vmem:[%s593_s5 + $0x8] sm:$0xff]  ;;  %v295_v17 = vld [vmem:[%s593_s5 + $0x10] sm:$0xff]  ;;  %v296_v18 = vld [vmem:[%s593_s5 + $0x18] sm:$0xff] }
   0xd   :  { %v335_v19 = vld [vmem:[#allocation2] sm:$0x1]  ;;  %v164_v39 = vld [vmem:[%s591_s3 + $0x8] sm:$0xff]  ;;  %v165_v40 = vld [vmem:[%s591_s3 + $0x10] sm:$0xff] }
   0xe   :  { %173 = vperm.xlu0 %416, %v167_v11   ;;  %v163_v20 = vld [vmem:[%s591_s3] sm:$0xff]  ;;  %v166_v41 = vld [vmem:[%s591_s3 + $0x18] sm:$0xff]  ;;  %v342_v11 = vshrl.u32 %v341_v8, 7  ;;  %s459_s3 = smov [#allocation3]  }
   0xf   :  { %178 = vperm.xlu1 %417, %v168_v12   ;;  %400 = vmatprep.mubr.msk.f32.mxu1 %vm191_vm1, %v163_v20  ;;  %s354_s14 = sshll.u32 %s459_s3, 4  ;;  %s355_s14 = int_to_ptr.vmem [resolvable:$true] %s354_s14 }
  0x10   :  { %s434_s15 = scalar_lea.vmem %s355_s14, 16  ;;  %s438_s16 = scalar_lea.vmem %s355_s14, 32 }
  0x11   :  { %p435_p0 = scmp.ne.s32.totalorder %s355_s14, %s434_s15  ;;  %p439_p1 = scmp.lt.s32.totalorder %s355_s14, %s355_s14 }
  0x12   :  { %183 = vperm.xlu0 %416, %v169_v13   ;;  %p440_p2 = scmp.lt.s32.totalorder %s438_s16, %s434_s15 }
  0x13   :  { %188 = vperm.xlu1 %417, %v170_v14   ;;  %v343_v14 = vsub.s32 0, %v342_v11 }
  0x14   :  { %p441_p3 = por %p440_p2, %p439_p1 }
  0x16   :  { %299 = vperm.xlu0 %416, %v293_v15   ;;  %p442_p4 = pnand %p441_p3, %p435_p0 }
  0x17   :  { %304 = vperm.xlu1 %417, %v294_v16  }
  0x1a   :  { %309 = vperm.xlu0 %416, %v295_v17  }
  0x1b   :  { %314 = vperm.xlu1 %417, %v296_v18  }
  0x1e   :  { %338 = vperm.xlu0 %416, %v335_v19  }
  0x85   :  { %v41_v21 = vpop.permute.xlu0 %40 }
  0x86   :  { %v51_v22 = vpop.permute.xlu1 %50 }
  0x89   :  { %v46_v23 = vpop.permute.xlu0 %45 }
  0x8a   :  { %v56_v28 = vpop.permute.xlu1 %55 }
  0x8d   :  { %v174_v43 = vpop.permute.xlu0 %173 }
  0x8e   :  { %v179_v42 = vpop.permute.xlu1 %178 }
  0x91   :  { %v184_v50 = vpop.permute.xlu0 %183 }
  0x92   :  { %v189_v48 = vpop.permute.xlu1 %188 }
  0x95   :  { %v300_v54 = vpop.permute.xlu0 %299 }
  0x96   :  { %v305_v55 = vpop.permute.xlu1 %304 }
  0x99   :  { %v310_v0 = vpop.permute.xlu0 %309 }
  0x9a   :  { %v315_v1 = vpop.permute.xlu1 %314 }
  0x9d   :  { %v339_v16 = vpop.permute.xlu0 %338 }
  0x9e   :  { %v344_v18 = vrot.slane %v339_v16, %v343_v14 }
  0xdb   :  { %v388_v24 = vpop.f32.mrb[0].mxu0 }
  0xdc   :  { %v146_v25 = vadd.f32 %v388_v24, %v46_v23  ;;  %v140_v26 = vpop.f32.mrb[1].mxu0 }
  0xdd   :  { %v141_v27 = vadd.f32 %v140_v26, %v41_v21 }
  0xde   :  { %418 = vtanh.f32 %v146_v25 }
  0xdf   :  { %420 = vtanh.f32 %v141_v27  ;;  %v391_v29 = vpop.f32.mrb[2].mxu0 }
  0xe0   :  { %v156_v30 = vadd.f32 %v391_v29, %v56_v28  ;;  %v150_v31 = vpop.f32.mrb[3].mxu0 }
  0xe1   :  { %v151_v32 = vadd.f32 %v150_v31, %v51_v22 }
  0xe2   :  { %422 = vtanh.f32 %v156_v30 }
  0xe3   :  { %424 = vtanh.f32 %v151_v32 }
  0xe8   :  { %v419_v33 = vpop.eup %418 }
  0xe9   :  { %v421_v34 = vpop.eup %420 }
  0xea   :  { %v406_v35 = vpack.c.bf16 %v419_v33, %v421_v34 }
  0xec   :  { %v423_v36 = vpop.eup %422  ;;  %407 = vmatprep.subr.bf16.mxu1 %v406_v35 }
  0xed   :  { %v425_v37 = vpop.eup %424  ;;  %409 = vmatpush3.bf16.msra.mxu1 %v406_v35 }
  0xee   :  { %v410_v38 = vpack.c.bf16 %v423_v36, %v425_v37 }
  0xf0   :  { %411 = vmatprep.subr.bf16.mxu1 %v410_v38 }
  0xf1   :  { %413 = vmatpush3.bf16.msra.mxu1 %v410_v38 }
  0xf4   :  { %401 = vmatmul.mubr.msk.f32.vlgmr.msra.gmra.mrb[0].mxu1 %vm191_vm1, %v164_v39 }
  0xf5   :  { %403 = vmatprep.mubr.msk.f32.mxu1 %vm191_vm1, %v165_v40 }
  0xf8   :  { %404 = vmatmul.mubr.msk.f32.gmra.mrb[2].mxu1 %vm191_vm1, %v166_v41 }
 0x1c7   :  { %v402_v44 = vpop.f32.mrb[0].mxu1 }
 0x1c8   :  { %v276_v45 = vadd.f32 %v402_v44, %v179_v42  ;;  %v270_v46 = vpop.f32.mrb[1].mxu1 }
 0x1c9   :  { %v271_v47 = vadd.f32 %v270_v46, %v174_v43 }
 0x1ca   :  { %426 = vtanh.f32 %v276_v45 }
 0x1cb   :  { %428 = vtanh.f32 %v271_v47  ;;  %v405_v49 = vpop.f32.mrb[2].mxu1 }
 0x1cc   :  { %v286_v51 = vadd.f32 %v405_v49, %v189_v48  ;;  %v280_v52 = vpop.f32.mrb[3].mxu1 }
 0x1cd   :  { %v281_v53 = vadd.f32 %v280_v52, %v184_v50 }
 0x1ce   :  { %430 = vtanh.f32 %v286_v51 }
 0x1cf   :  { %432 = vtanh.f32 %v281_v53 }
 0x1d4   :  { %v427_v56 = vpop.eup %426 }
 0x1d5   :  { %v429_v57 = vpop.eup %428  ;;  %v318_v58 = vmul.f32 %v427_v56, %v305_v55 }
 0x1d6   :  { %v317_v59 = vmul.f32 %v429_v57, %v300_v54 }
 0x1d7   :  { %v323_v60 = vsel %vm321_vm2, %v318_v58, 0.0 }
 0x1d8   :  { %v431_v61 = vpop.eup %430  ;;  %v322_v62 = vsel %vm321_vm2, %v317_v59, 0.0 }
 0x1d9   :  { %v433_v63 = vpop.eup %432  ;;  %v324_v2 = vadd.f32 %v323_v60, %v322_v62  ;;  %v320_v3 = vmul.f32 %v431_v61, %v315_v1 }
 0x1da   :  { %v319_v4 = vmul.f32 %v433_v63, %v310_v0 }
 0x1db   :  { %v327_v7 = vsel %vm321_vm2, %v320_v3, 0.0 }
 0x1dc   :  { %v325_v5 = vsel %vm321_vm2, %v319_v4, 0.0 }
 0x1dd   :  { %v326_v6 = vadd.f32 %v325_v5, %v324_v2 }
 0x1df   :  { %v328_v9 = vadd.f32 %v327_v7, %v326_v6 }
 0x1e1   :  { %v329_v10 = vrot.slane %v328_v9, 4 }
 0x1e3   :  { %v330_v12 = vadd.f32 %v329_v10, %v328_v9 }
 0x1e5   :  { %v331_v13 = vrot.slane %v330_v12, 2 }
 0x1e7   :  { %v332_v15 = vadd.f32 %v331_v13, %v330_v12 }
 0x1e9   :  { %v333_v17 = vrot.slane %v332_v15, 1 }
 0x1eb   :  { %v334_v19 = vadd.f32 %v333_v17, %v332_v15 }
 0x1ed   :  { %v345_v20 = vadd.f32 %v344_v18, %v334_v19 }
 0x1ef   :  { %347 = vst.msk [vmem:[#allocation3] sm:$0x1] %vm346_vm3, %v345_v20 }
 0x1f0   :  { %445 = shalt.err (!%p442_p4)
}
 0x1f1   :  { %s446_s19 = scalar_lea.hbm %s595_s7, 16 }
 0x1f2   :  { %p447_p5 = scmp.ne.s32.totalorder %s595_s7, %s446_s19  ;;  %p450_p6 = scmp.lt.u32.totalorder %s446_s19, %s595_s7 }
 0x1f4   :  { %p452_p7 = pnand %p450_p6, %p447_p5 }
 0x1f6   :  { %455 = shalt.err (!%p452_p7)
}
 0x1f7   :  { %357 = dma.vmem_to_hbm [thread:$0]  %s355_s14, 16, %s595_s7, [#allocation4]  }
 0x1f8   :  { %456 = dma.done.wait [#allocation4], 16  }
 0x1f9   :  { %457 = vsyncadd [#allocation4], 4294967280 }
 0x1fa   :  { %361 = vsyncpa [#allocation4], 1 }

</bundles_post_ra>
